<compile_context>
chip_gen: v7x
topology: tpu7x:2x2x1
jax: 0.10.0
libtpu: 0.0.40
codegen_flags: <defaults>
</compile_context>

<pallas_src>
import functools

import jax
import jax.numpy as jnp
from jax.experimental import pallas as pl
from jax.experimental.pallas import tpu as pltpu

# bf16 operands + f32 accumulate = 1 MXU pass (per perf review).  Use jnp.float32 here
# (plus precision=HIGHEST in the dot) if exact-f32 conv numerics are required.
_MATMUL_DTYPE = jnp.bfloat16


def _uvt_embed_kernel(x_ref, w_ref, add_ref, cls_ref, out_ref, *, n_tok, e_pad, npw):
    # x_ref:   (R, p*H)           f32  one batch element (pure row-major view of x)
    # w_ref:   (p*H, npw*e_pad)   f32  block-structured conv weight   (grid-invariant)
    # add_ref: (R,  npw*e_pad)    f32  pos-emb + conv bias per token  (grid-invariant)
    # cls_ref: (1,  e_pad)        f32  pos-emb[0] + cls token         (grid-invariant)
    # out_ref: (n_tok+1, e_pad)   f32  final embeddings for this batch element
    acc = jnp.dot(
        x_ref[...].astype(_MATMUL_DTYPE),
        w_ref[...].astype(_MATMUL_DTYPE),
        preferred_element_type=jnp.float32,
    )
    tok = acc + add_ref[...]
    if npw > 1:  # no-op for the module's actual config (patch_size == img_size)
        tok = tok.reshape(n_tok, e_pad)
    out_ref[pl.ds(0, 1), :] = cls_ref[...].astype(out_ref.dtype)
    out_ref[pl.ds(1, n_tok), :] = tok.astype(out_ref.dtype)


def uvt_embd_2d_patch(x, conv_weight, conv_bias, cls_token, position_embeddings,
                      patch_size):
    """Forward pass of UVTEmbd2DPatchV1 (eval mode).

    x:                    (B, T, W, H, C) f32
    conv_weight:          (E, 1, p, p)    f32   (Conv2d weight, kernel == stride == p)
    conv_bias:            (E,)            f32
    cls_token:            (1, 1, E)       f32
    position_embeddings:  (1, N+1, E)     f32   (N = T*C*(W/p)*(H/p))
    Returns (B, N+1, E).
    """
    B, T, W, H, C = x.shape
    E = conv_weight.shape[0]
    p = patch_size
    V = T * C
    nph, npw = W // p, H // p
    assert nph * p == W and npw * p == H, "patch_size must tile the image"
    n_tok = V * nph * npw
    n1 = n_tok + 1
    assert position_embeddings.shape == (1, n1, E), (
        f"position embeddings {position_embeddings.shape} != {(1, n1, E)}")
    R = V * nph                         # matmul rows per batch element
    Kb = p * H                          # contraction length
    E_pad = ((E + 127) // 128) * 128    # lane-dense output columns

    # Zero-copy row-major views of x (faithful to torch.reshape's flat semantics).
    x_rows = jnp.reshape(x, (B, R, Kb))                 # row (v, ph), col (dh, h)

    # Block-structured weight: W_big[dh*H + pw*p + dw, pw*E_pad + e] = conv_w[e,0,dh,dw].
    # Tiny trace-time construction; identical to the plain (p*p, E) filter when npw==1.
    w_t = jnp.transpose(conv_weight.reshape(E, p, p), (1, 2, 0))      # (dh, dw, e)
    eye = jnp.eye(npw, dtype=w_t.dtype)
    w_big = jnp.einsum("dwe,qr->dqwre", w_t, eye).reshape(Kb, npw, E)
    add_tok = (position_embeddings[0, 1:] + conv_bias[None, :]).reshape(R, npw, E)
    cls_row = position_embeddings[0, :1] + cls_token[0]               # (1, E)
    if E_pad != E:
        pad3 = ((0, 0), (0, 0), (0, E_pad - E))
        w_big = jnp.pad(w_big, pad3)
        add_tok = jnp.pad(add_tok, pad3)
        cls_row = jnp.pad(cls_row, ((0, 0), (0, E_pad - E)))
    w_big = w_big.reshape(Kb, npw * E_pad)
    add_tok = add_tok.reshape(R, npw * E_pad)

    kernel = functools.partial(_uvt_embed_kernel, n_tok=n_tok, e_pad=E_pad, npw=npw)
    cost = pl.CostEstimate(
        flops=2 * B * R * Kb * npw * E_pad,
        transcendentals=0,
        bytes_accessed=4 * (B * R * Kb + Kb * npw * E_pad + R * npw * E_pad
                            + E_pad + B * n1 * E_pad),
    )

    out = pl.pallas_call(
        kernel,
        out_shape=jax.ShapeDtypeStruct((B, n1, E_pad), x.dtype),
        grid=(B,),
        in_specs=[
            # Last two block dims equal the full array dims -> (8,128)-legal.
            pl.BlockSpec((None, R, Kb), lambda b: (b, 0, 0)),
            pl.BlockSpec((Kb, npw * E_pad), lambda b: (0, 0)),
            pl.BlockSpec((R, npw * E_pad), lambda b: (0, 0)),
            pl.BlockSpec((1, E_pad), lambda b: (0, 0)),
        ],
        out_specs=pl.BlockSpec((None, n1, E_pad), lambda b: (b, 0, 0)),
        compiler_params=pltpu.CompilerParams(
            dimension_semantics=("parallel",),
            vmem_limit_bytes=32 * 1024 * 1024,
        ),
        cost_estimate=cost,
    )(x_rows, w_big, add_tok, cls_row)

    if E_pad != E:   # only for odd embd_size; prod E=1024 takes the no-slice path
        out = out[:, :, :E]
    return out


def _reference_forward(x, conv_w, conv_b, cls_token, pos_emb, p):
    """Pure-JAX f32 mirror of the PyTorch forward (eval mode), via lax.conv."""
    B, T, W, H, C = x.shape
    E = conv_w.shape[0]
    V = T * C
    x4 = jnp.reshape(x, (B, V, W, H))
    toks = []
    for i in range(V):
        xi = x4[:, i:i + 1]  # (B, 1, W, H)
        yi = jax.lax.conv_general_dilated(
            xi, conv_w, window_strides=(p, p), padding="VALID",
            dimension_numbers=("NCHW", "OIHW", "NCHW"),
            precision=jax.lax.Precision.HIGHEST,
        )  # (B, E, nph, npw)
        yi = yi + conv_b[None, :, None, None]
        yi = yi.reshape(B, E, -1).transpose(0, 2, 1)  # (B, nph*npw, E)
        toks.append(yi)
    xs = jnp.concatenate(toks, axis=1)
    cls_b = jnp.broadcast_to(cls_token, (B, 1, E))
    xs = jnp.concatenate([cls_b, xs], axis=1)
    return xs + pos_emb


if __name__ == "__main__":
    key = jax.random.PRNGKey(0)
    kx, kw, kb, kc, kp = jax.random.split(key, 5)

    # Small shapes consistent with the module: patch_size == config.img_size (each
    # variable image is exactly one patch), n_patches = T*C, E = embd_size.
    B, T, W, H, C = 2, 2, 16, 16, 4
    patch = 16
    E = 32
    V = T * C
    n_tok = V * (W // patch) * (H // patch)      # 8 tokens
    n1 = n_tok + 1                               # + cls

    x = jax.random.normal(kx, (B, T, W, H, C), dtype=jnp.float32)
    conv_w = 0.05 * jax.random.normal(kw, (E, 1, patch, patch), dtype=jnp.float32)
    conv_b = 0.1 * jax.random.normal(kb, (E,), dtype=jnp.float32)
    cls_token = 0.1 * jax.random.normal(kc, (1, 1, E), dtype=jnp.float32)
    pos_emb = 0.1 * jax.random.normal(kp, (1, n1, E), dtype=jnp.float32)

    fwd = jax.jit(uvt_embd_2d_patch, static_argnames=("patch_size",))
    out = fwd(x, conv_w, conv_b, cls_token, pos_emb, patch_size=patch)
    out = jax.block_until_ready(out)

    ref = _reference_forward(x, conv_w, conv_b, cls_token, pos_emb, patch)
    assert out.shape == (B, n1, E), out.shape
    err = float(jnp.max(jnp.abs(out - ref)))
    # bf16-operand / f32-accumulate matmul vs the f32 conv reference: expected max abs
    # error ~3e-3 at these magnitudes; any structural bug (missing bias/pos/cls, wrong
    # token order) produces errors >= 5e-2.
    assert err < 2e-2, f"mismatch vs reference: max abs err {err}"

    print("KERNEL_OK")
</pallas_src>

<mosaic_0001>
module attributes {stable_mosaic.version = 11 : i64} {
  func.func @_uvt_embed_kernel(%arg0: i32, %arg1: memref<1x8x256xf32, #tpu.memory_space<vmem>>, %arg2: memref<256x128xf32, #tpu.memory_space<vmem>>, %arg3: memref<8x128xf32, #tpu.memory_space<vmem>>, %arg4: memref<1x128xf32, #tpu.memory_space<vmem>>, %arg5: memref<1x9x128xf32, #tpu.memory_space<vmem>>) attributes {dimension_semantics = [#tpu.dimension_semantics<parallel>], iteration_bounds = array<i64: 2>, scalar_prefetch = 0 : i64, scratch_operands = 0 : i64, tpu.core_type = #tpu.core_type<tc>, window_params = [{transform_indices = @transform_0, window_bounds = array<i64: 1, 8, 256>}, {pipeline_mode = #tpu.pipeline_mode<synchronous>, transform_indices = @transform_1, window_bounds = array<i64: 256, 128>}, {pipeline_mode = #tpu.pipeline_mode<synchronous>, transform_indices = @transform_2, window_bounds = array<i64: 8, 128>}, {pipeline_mode = #tpu.pipeline_mode<synchronous>, transform_indices = @transform_3, window_bounds = array<i64: 1, 128>}, {transform_indices = @transform_4, window_bounds = array<i64: 1, 9, 128>}]} {
    %c0 = arith.constant 0 : index
    %c0_0 = arith.constant 0 : index
    %c0_1 = arith.constant 0 : index
    %0 = vector.load %arg1[%c0, %c0_0, %c0_1] : memref<1x8x256xf32, #tpu.memory_space<vmem>>, vector<1x8x256xf32>
    %1 = vector.shape_cast %0 : vector<1x8x256xf32> to vector<8x256xf32>
    %2 = arith.truncf %1 : vector<8x256xf32> to vector<8x256xbf16>
    %c0_2 = arith.constant 0 : index
    %c0_3 = arith.constant 0 : index
    %3 = vector.load %arg2[%c0_2, %c0_3] : memref<256x128xf32, #tpu.memory_space<vmem>>, vector<256x128xf32>
    %4 = arith.truncf %3 : vector<256x128xf32> to vector<256x128xbf16>
    %cst = arith.constant dense<0.000000e+00> : vector<8x128xf32>
    %5 = tpu.matmul %2, %4, %cst {dimension_numbers = #tpu.dot_dimension_numbers<[1], [0], [0], [1], [0, 0, 1, 1], [], []>} : vector<8x256xbf16>, vector<256x128xbf16>, vector<8x128xf32> -> vector<8x128xf32>
    %c0_4 = arith.constant 0 : index
    %c0_5 = arith.constant 0 : index
    %6 = vector.load %arg3[%c0_4, %c0_5] : memref<8x128xf32, #tpu.memory_space<vmem>>, vector<8x128xf32>
    %7 = arith.addf %5, %6 : vector<8x128xf32>
    %c0_6 = arith.constant 0 : index
    %c0_7 = arith.constant 0 : index
    %8 = vector.load %arg4[%c0_6, %c0_7] : memref<1x128xf32, #tpu.memory_space<vmem>>, vector<1x128xf32>
    %c0_8 = arith.constant 0 : index
    %c0_9 = arith.constant 0 : index
    %c0_10 = arith.constant 0 : index
    %9 = vector.load %arg5[%c0_8, %c0_9, %c0_10] : memref<1x9x128xf32, #tpu.memory_space<vmem>>, vector<1x1x128xf32>
    %10 = vector.shape_cast %9 : vector<1x1x128xf32> to vector<1x128xf32>
    %11 = vector.shape_cast %8 : vector<1x128xf32> to vector<1x1x128xf32>
    tpu.vector_store %arg5[%c0_8, %c0_9, %c0_10], %11 {strides = array<i32>} : memref<1x9x128xf32, #tpu.memory_space<vmem>>, vector<1x1x128xf32>,
    %c0_11 = arith.constant 0 : index
    %c1 = arith.constant 1 : index
    %c0_12 = arith.constant 0 : index
    %12 = vector.load %arg5[%c0_11, %c1, %c0_12] : memref<1x9x128xf32, #tpu.memory_space<vmem>>, vector<1x8x128xf32>
    %13 = vector.shape_cast %12 : vector<1x8x128xf32> to vector<8x128xf32>
    %14 = vector.shape_cast %7 : vector<8x128xf32> to vector<1x8x128xf32>
    tpu.vector_store %arg5[%c0_11, %c1, %c0_12], %14 {strides = array<i32>} : memref<1x9x128xf32, #tpu.memory_space<vmem>>, vector<1x8x128xf32>,
    return
  }
  func.func @transform_0(%arg0: i32) -> (i32, i32, i32) {
    %c0_i32 = arith.constant 0 : i32
    %c0_i32_0 = arith.constant 0 : i32
    %c0_i32_1 = arith.constant 0 : i32
    return %arg0, %c0_i32, %c0_i32_0 : i32, i32, i32
  }
  func.func @transform_1(%arg0: i32) -> (i32, i32) {
    %c0_i32 = arith.constant 0 : i32
    %c0_i32_0 = arith.constant 0 : i32
    %c0_i32_1 = arith.constant 0 : i32
    return %c0_i32, %c0_i32_0 : i32, i32
  }
  func.func @transform_2(%arg0: i32) -> (i32, i32) {
    %c0_i32 = arith.constant 0 : i32
    %c0_i32_0 = arith.constant 0 : i32
    %c0_i32_1 = arith.constant 0 : i32
    return %c0_i32, %c0_i32_0 : i32, i32
  }
  func.func @transform_3(%arg0: i32) -> (i32, i32) {
    %c0_i32 = arith.constant 0 : i32
    %c0_i32_0 = arith.constant 0 : i32
    %c0_i32_1 = arith.constant 0 : i32
    return %c0_i32, %c0_i32_0 : i32, i32
  }
  func.func @transform_4(%arg0: i32) -> (i32, i32, i32) {
    %c0_i32 = arith.constant 0 : i32
    %c0_i32_0 = arith.constant 0 : i32
    %c0_i32_1 = arith.constant 0 : i32
    return %arg0, %c0_i32, %c0_i32_0 : i32, i32, i32
  }
}

</mosaic_0001>

<bundles_post_ra>
// kernel: uvt_embd_2d_patch.1
= control target key start
LH: loop header
LB: loop body
LE: loop exit
PB: predicated region body
PF: predicated region fallthrough
CT: control target
= control target key end

     0   :  { %s426_s15 = smov 0   ;;  %s553_s0 = inlined_call_operand.vmem [shape: f32[2,8,256], index: 0, kind: input, shape index: {}]   ;;  %s554_s1 = inlined_call_operand.vmem [shape: f32[256,128], index: 1, kind: input, shape index: {}]   ;;  %s555_s2 = inlined_call_operand.vmem [shape: f32[8,128], index: 2, kind: input, shape index: {}]   ;;  %s556_s3 = inlined_call_operand.vmem [shape: f32[1,128], index: 3, kind: input, shape index: {}]   ;;  %s557_s4 = inlined_call_operand.vmem [shape: f32[2,9,128], index: 4, kind: output, shape index: {}]  }
   0x1 LB: > { %s350_s16 = sadd.s32 4294967295, %s399_s15   ;;  %p354_p0 = scmp.ge.s32.totalorder %s399_s15, 1  ;;  %s399_s15 = sphi %s426_s15, %s14_s15  }
   0x2   : > { %p162_p1 = scmp.lt.s32.totalorder %s399_s15, 3 }
   0x4   : > { %p163_p2 = pnand %p354_p0, %p162_p1 }
   0x5   : > { %v219_v0 = vld [vmem:[%s554_s1 + $0x80] sm:$0xff] (!%p163_p2)  ;;  %v220_v1 = vld [vmem:[%s554_s1 + $0x88] sm:$0xff] (!%p163_p2)  ;;  %p188_p3 = scmp.lt.s32.totalorder (!%p163_p2), %s350_s16, 1  ;;  %v221_v5 = vld [vmem:[%s554_s1 + $0x90] sm:$0xff] (!%p163_p2) }
   0x6   : > { %166 = sbr.rel (%p163_p2) target bundleno = 258 (0x102), region = 36  ;;  %v203_v2 = vld [vmem:[%s554_s1] sm:$0xff] (!%p163_p2)  ;;  %v243_v3 = vpack.c.bf16 (!%p163_p2), %v220_v1, %v219_v0  ;;  %v204_v4 = vld [vmem:[%s554_s1 + $0x8] sm:$0xff] (!%p163_p2)  ;;  %v222_v6 = vld [vmem:[%s554_s1 + $0x98] sm:$0xff] (!%p163_p2) }
   0x7   : > { %v235_v7 = vpack.c.bf16 (!%p163_p2), %v204_v4, %v203_v2  ;;  %v244_v8 = vpack.c.bf16 (!%p163_p2), %v222_v6, %v221_v5  ;;  %v205_v9 = vld [vmem:[%s554_s1 + $0x10] sm:$0xff] (!%p163_p2)  ;;  %v206_v10 = vld [vmem:[%s554_s1 + $0x18] sm:$0xff] (!%p163_p2)  ;;  %v223_v11 = vld [vmem:[%s554_s1 + $0xa0] sm:$0xff] (!%p163_p2) }
   0x8   : > { %363 = vmatprep.subr.bf16.mxu0 (!%p163_p2), %v243_v3  ;;  %v224_v12 = vld [vmem:[%s554_s1 + $0xa8] sm:$0xff] (!%p163_p2)  ;;  %v236_v13 = vpack.c.bf16 (!%p163_p2), %v206_v10, %v205_v9  ;;  %v207_v15 = vld [vmem:[%s554_s1 + $0x20] sm:$0xff] (!%p163_p2)  ;;  %v225_v17 = vld [vmem:[%s554_s1 + $0xb0] sm:$0xff] (!%p163_p2) }
   0x9   : > { %364 = vmatpush3.bf16.msra.mxu0 (!%p163_p2), %v235_v7  ;;  %v245_v14 = vpack.c.bf16 (!%p163_p2), %v224_v12, %v223_v11  ;;  %v208_v16 = vld [vmem:[%s554_s1 + $0x28] sm:$0xff] (!%p163_p2)  ;;  %v226_v18 = vld [vmem:[%s554_s1 + $0xb8] sm:$0xff] (!%p163_p2)  ;;  %v209_v21 = vld [vmem:[%s554_s1 + $0x30] sm:$0xff] (!%p163_p2) }
   0xa   : > { %365 = vmatprep.subr.bf16.mxu0 (!%p163_p2), %v244_v8  ;;  %v237_v19 = vpack.c.bf16 (!%p163_p2), %v208_v16, %v207_v15  ;;  %v246_v20 = vpack.c.bf16 (!%p163_p2), %v226_v18, %v225_v17  ;;  %v210_v22 = vld [vmem:[%s554_s1 + $0x38] sm:$0xff] (!%p163_p2)  ;;  %v227_v23 = vld [vmem:[%s554_s1 + $0xc0] sm:$0xff] (!%p163_p2)  ;;  %v228_v24 = vld [vmem:[%s554_s1 + $0xc8] sm:$0xff] (!%p163_p2) }
   0xb   : > { %v292_v26 = vld [vmem:[%s556_s3] sm:$0x1] (!%p163_p2)  ;;  %v238_v27 = vpack.c.bf16 (!%p163_p2), %v210_v22, %v209_v21  ;;  %v247_v29 = vpack.c.bf16 (!%p163_p2), %v228_v24, %v227_v23  ;;  %v212_v31 = vld [vmem:[%s554_s1 + $0x48] sm:$0xff] (!%p163_p2)  ;;  %v229_v32 = vld [vmem:[%s554_s1 + $0xd0] sm:$0xff] (!%p163_p2) }
   0xc   : > { %v211_v30 = vld [vmem:[%s554_s1 + $0x40] sm:$0xff] (!%p163_p2)  ;;  %v230_v33 = vld [vmem:[%s554_s1 + $0xd8] sm:$0xff] (!%p163_p2)  ;;  %v213_v36 = vld [vmem:[%s554_s1 + $0x50] sm:$0xff] (!%p163_p2) }
   0xd   : > { %s559_s16 = smov (!%p188_p3, %s350_s16), 1  ;;  %366 = vmatpush3.bf16.msra.mxu0 %v236_v13  ;;  %v239_v34 = vpack.c.bf16 %v212_v31, %v211_v30  ;;  %v248_v35 = vpack.c.bf16 %v230_v33, %v229_v32  ;;  %v214_v37 = vld [vmem:[%s554_s1 + $0x58] sm:$0xff]  ;;  %v231_v38 = vld [vmem:[%s554_s1 + $0xe0] sm:$0xff]  ;;  %v232_v39 = vld [vmem:[%s554_s1 + $0xe8] sm:$0xff] }
   0xe   : > { %s361_s17 = sshll.u32 %s559_s16, 4  ;;  %367 = vmatprep.subr.bf16.mxu0 %v245_v14  ;;  %v240_v40 = vpack.c.bf16 %v214_v37, %v213_v36  ;;  %v249_v41 = vpack.c.bf16 %v232_v39, %v231_v38  ;;  %v215_v42 = vld [vmem:[%s554_s1 + $0x60] sm:$0xff]  ;;  %v216_v43 = vld [vmem:[%s554_s1 + $0x68] sm:$0xff]  ;;  %v233_v44 = vld [vmem:[%s554_s1 + $0xf0] sm:$0xff] }
   0xf   : > { %s479_s24 = scalar_lea.vmem %s553_s0, %s361_s17  ;;  %s490_s30 = scalar_lea.vmem %s557_s4, %s361_s17  ;;  %v234_v45 = vld [vmem:[%s554_s1 + $0xf8] sm:$0xff]  ;;  %v241_v46 = vpack.c.bf16 %v216_v43, %v215_v42  ;;  %v217_v48 = vld [vmem:[%s554_s1 + $0x70] sm:$0xff]  ;;  %v251_v54 = vld [vmem:[%s555_s2] sm:$0xff] }
  0x10   : > { %v200_v25 = vld [vmem:[%s479_s24 + $0x8] sm:$0xff]  ;;  %293 = vst [vmem:[%s490_s30] sm:$0x1] %v292_v26  ;;  %v250_v47 = vpack.c.bf16 %v234_v45, %v233_v44  ;;  %v218_v49 = vld [vmem:[%s554_s1 + $0x78] sm:$0xff]  ;;  %v199_v51 = vld [vmem:[%s479_s24] sm:$0xff] }
  0x11   : > { %368 = vmatpush3.bf16.msra.mxu0 %v237_v19  ;;  %v202_v28 = vpack.c.bf16 %v200_v25, %v200_v25  ;;  %v242_v50 = vpack.c.bf16 %v218_v49, %v217_v48  ;;  %v201_v52 = vpack.c.bf16 %v199_v51, %v199_v51 }
  0x12   : > { %369 = vmatprep.subr.bf16.mxu0 %v246_v20 }
  0x13   : > { %284 = vmatprep.mubr.bf16.mxu0 %v202_v28 }
  0x15   : > { %370 = vmatpush3.bf16.msra.mxu0 %v238_v27 }
  0x16   : > { %371 = vmatprep.subr.bf16.mxu0 %v247_v29 }
  0x19   : > { %372 = vmatpush3.bf16.msra.mxu0 %v239_v34 }
  0x1a   : > { %373 = vmatprep.subr.bf16.mxu0 %v248_v35 }
  0x1d   : > { %374 = vmatpush3.bf16.msra.mxu0 %v240_v40 }
  0x1e   : > { %375 = vmatprep.subr.bf16.mxu0 %v249_v41 }
  0x21   : > { %376 = vmatpush3.bf16.msra.mxu0 %v241_v46 }
  0x22   : > { %377 = vmatprep.subr.bf16.mxu0 %v250_v47 }
  0x25   : > { %378 = vmatpush3.bf16.msra.mxu0 %v242_v50 }
  0x28   : > { %285 = vmatmul.mubr.bf16.vlgmr.msra.gmra.mrb[0].mxu0 %v201_v52 }
  0xfb   : > { %v379_v53 = vpop.f32.mrb[0].mxu0 }
  0xfc   : > { %v380_v55 = vpop.f32.mrb[1].mxu0 }
  0xfd   : > { %v381_v56 = vadd.f32 %v380_v55, %v379_v53  ;;  %v382_v57 = vpop.f32.mrb[2].mxu0 }
  0xfe   : > { %v383_v58 = vpop.f32.mrb[3].mxu0 }
  0xff   : > { %v287_v59 = vadd.f32 %v381_v56, %v251_v54 }
 0x101   : > { %294 = vst [vmem:[%s490_s30 + $0x1] sm:$0xff] %v287_v59 }
 0x102 PF: > { %s14_s15 = sadd.s32 1, %s399_s15  }
 0x103   : > { %p11_p4 = scmp.ge.s32.totalorder %s14_s15, 4  }
 0x105   :  { %13 = sbr.rel (!%p11_p4) target bundleno = 1 (0x1), region = 66 }

</bundles_post_ra>
